<compile_context>
chip_gen: v7x
topology: tpu7x:2x2x1
jax: 0.10.0
libtpu: 0.0.40
codegen_flags: <defaults>
</compile_context>

<pallas_src>
import functools

import jax
import jax.numpy as jnp
from jax import lax
from jax.experimental import pallas as pl
from jax.experimental.pallas import tpu as pltpu


# --------------------------------------------------------------------------------------
# Kernel 1: temporal conv (im2col single matmul) + fused BN partial stats
# --------------------------------------------------------------------------------------
def _conv_bn_stats_kernel(x_ref, w_ref, b_ref, y_ref, s_ref, ss_ref, *, tap_starts, t_tile):
    # x_ref : (1, 1, L, V, C_in)   gathered input window for this (batch, T-tile)
    # w_ref : (K*C_in, C_out)      conv weight, rows ordered (k, c_in)
    # b_ref : (1, C_out)           conv bias (f32)
    # y_ref : (1, 1, t_tile*V, C_out)
    # s_ref, ss_ref : (1, 1, 1, C_out) per-tile channel sum / sum-of-squares
    _, _, _, V, C_in = x_ref.shape
    M = t_tile * V

    # im2col: K contiguous shifted slices, concatenated along the channel (lane) dim.
    taps = [x_ref[0, 0, pl.ds(st, t_tile), :, :].reshape(M, C_in) for st in tap_starts]
    xcol = taps[0] if len(taps) == 1 else jnp.concatenate(taps, axis=-1)   # (M, K*C_in)

    # Single MXU matmul, f32 accumulation (operands kept in their native dtype).
    acc = jnp.dot(xcol, w_ref[...], preferred_element_type=jnp.float32)    # (M, C_out)
    acc = acc + b_ref[...]                                                 # bias broadcast

    # Fused BatchNorm partials (biased batch stats finalized in the wrapper).
    s_ref[0, 0] = jnp.sum(acc, axis=0, keepdims=True)
    ss_ref[0, 0] = jnp.sum(acc * acc, axis=0, keepdims=True)

    y_ref[0, 0] = acc.astype(y_ref.dtype)


# --------------------------------------------------------------------------------------
# Kernel 2: BN apply (lane-dense rows, multiple rows per grid step)
# --------------------------------------------------------------------------------------
def _bn_apply_kernel(y_ref, sc_ref, sh_ref, o_ref):
    # y_ref/o_ref : (tR, 1, Lrow);  sc_ref/sh_ref : (1, 1, Lrow) (per-channel, pre-tiled)
    o_ref[...] = (y_ref[...].astype(jnp.float32) * sc_ref[...] + sh_ref[...]).astype(o_ref.dtype)


# --------------------------------------------------------------------------------------
# Tiling helpers
# --------------------------------------------------------------------------------------
def _pick_t_tile(T_out, V, C_in, C_out, K, stride, dilation, itemsize,
                 requested=None, budget_bytes=6 * 1024 * 1024):
    def window_len(tt):
        return tt + dilation * (K - 1) if stride == 1 else K * tt

    def fits(tt):
        in_b = window_len(tt) * V * C_in * itemsize
        out_b = tt * V * C_out * itemsize
        return 2 * (in_b + out_b) <= budget_bytes          # 2x for double buffering

    divisors = [d for d in range(1, T_out + 1) if T_out % d == 0]
    if requested is not None and T_out % requested == 0 and fits(requested):
        return requested
    fitting = [d for d in divisors if d <= 512 and fits(d)]
    return max(fitting) if fitting else divisors[0]


def _pick_row_tile(rows, Lrow, itemsize, budget_bytes=8 * 1024 * 1024):
    def fits(d):
        return 4 * d * Lrow * itemsize <= budget_bytes      # in+out, double buffered
    divisors = [d for d in range(1, rows + 1) if rows % d == 0]
    fitting = [d for d in divisors if d <= 1024 and fits(d)]
    return max(fitting) if fitting else 1


# --------------------------------------------------------------------------------------
# Public wrapper: PyTorch NCHW in / NCHW out
# --------------------------------------------------------------------------------------
def temporal_conv_forward(x_nchw, w_oik1, bias, gamma, beta, *,
                          kernel_size, stride=1, dilation=1, eps=1e-5, t_tile=None):
    N, C_in, T, V = x_nchw.shape
    C_out = w_oik1.shape[0]
    K = kernel_size
    pad = (K + (K - 1) * (dilation - 1) - 1) // 2
    T_pad = T + 2 * pad
    T_out = (T_pad - dilation * (K - 1) - 1) // stride + 1

    itemsize = jnp.dtype(x_nchw.dtype).itemsize
    tT = _pick_t_tile(T_out, V, C_in, C_out, K, stride, dilation, itemsize, requested=t_tile)
    nT = T_out // tT
    M = tT * V

    # ---- layout glue: NCHW -> NTVC, zero-pad T, gather per-tile input windows ----------
    # (stride/dilation are absorbed here so in-kernel tap loads are contiguous)
    x_ntvc = jnp.transpose(x_nchw, (0, 2, 3, 1))                       # (N, T, V, C_in)
    x_padded = jnp.pad(x_ntvc, ((0, 0), (pad, pad), (0, 0), (0, 0)))   # (N, T_pad, V, C_in)
    if stride == 1:
        # Overlapping window: taps share frames -> minimal duplication.
        L = tT + dilation * (K - 1)
        idx = (jnp.arange(nT) * tT)[:, None] + jnp.arange(L)[None, :]          # (nT, L)
        x_win = x_padded[:, idx]                                               # (N,nT,L,V,C_in)
        tap_starts = tuple(k * dilation for k in range(K))
    else:
        # Gather exactly the K taps (K*tT frames) -> no dead frames in VMEM/HBM.
        L = K * tT
        idx = ((jnp.arange(nT) * (tT * stride))[:, None, None]
               + (jnp.arange(K) * dilation)[None, :, None]
               + (jnp.arange(tT) * stride)[None, None, :])                     # (nT, K, tT)
        x_win = x_padded[:, idx].reshape(N, nT, L, V, C_in)
        tap_starts = tuple(k * tT for k in range(K))

    w2 = jnp.transpose(w_oik1[..., 0], (2, 1, 0)).reshape(K * C_in, C_out)     # rows = (k, c_in)
    b2 = bias.reshape(1, C_out).astype(jnp.float32)

    cparams = pltpu.CompilerParams(
        dimension_semantics=("parallel", "parallel"),
        vmem_limit_bytes=32 * 1024 * 1024,      # within scoped/physical VMEM on v5e/v6e/v7x
    )

    conv_kernel = functools.partial(_conv_bn_stats_kernel, tap_starts=tap_starts, t_tile=tT)
    y, psum, psumsq = pl.pallas_call(
        conv_kernel,
        out_shape=(
            jax.ShapeDtypeStruct((N, nT, M, C_out), x_nchw.dtype),
            jax.ShapeDtypeStruct((N, nT, 1, C_out), jnp.float32),
            jax.ShapeDtypeStruct((N, nT, 1, C_out), jnp.float32),
        ),
        grid=(N, nT),
        in_specs=[
            pl.BlockSpec((1, 1, L, V, C_in), lambda n, i: (n, i, 0, 0, 0)),
            pl.BlockSpec((K * C_in, C_out), lambda n, i: (0, 0)),
            pl.BlockSpec((1, C_out), lambda n, i: (0, 0)),
        ],
        out_specs=(
            pl.BlockSpec((1, 1, M, C_out), lambda n, i: (n, i, 0, 0)),
            pl.BlockSpec((1, 1, 1, C_out), lambda n, i: (n, i, 0, 0)),
            pl.BlockSpec((1, 1, 1, C_out), lambda n, i: (n, i, 0, 0)),
        ),
        compiler_params=cparams,
    )(x_win, w2, b2)

    # ---- finalize BN batch stats (tiny) -------------------------------------------------
    cnt = jnp.float32(N * T_out * V)
    mean = jnp.sum(psum, axis=(0, 1, 2)) / cnt
    var = jnp.maximum(jnp.sum(psumsq, axis=(0, 1, 2)) / cnt - mean * mean, 0.0)  # biased var
    inv = lax.rsqrt(var + eps)
    scale = gamma.astype(jnp.float32) * inv
    shift = beta.astype(jnp.float32) - mean * scale

    # ---- BN apply: lane-dense row tiles, y aliased onto the output ----------------------
    Lrow = M * C_out
    rows = N * nT
    tR = _pick_row_tile(rows, Lrow, itemsize)
    y_rows = y.reshape(rows, 1, Lrow)                            # free (contiguous) reshape
    scale_row = jnp.tile(scale, M).reshape(1, 1, Lrow)
    shift_row = jnp.tile(shift, M).reshape(1, 1, Lrow)

    z_rows = pl.pallas_call(
        _bn_apply_kernel,
        out_shape=jax.ShapeDtypeStruct((rows, 1, Lrow), y.dtype),
        grid=(rows // tR,),
        in_specs=[
            pl.BlockSpec((tR, 1, Lrow), lambda r: (r, 0, 0)),
            pl.BlockSpec((1, 1, Lrow), lambda r: (0, 0, 0)),
            pl.BlockSpec((1, 1, Lrow), lambda r: (0, 0, 0)),
        ],
        out_specs=pl.BlockSpec((tR, 1, Lrow), lambda r: (r, 0, 0)),
        input_output_aliases={0: 0},
        compiler_params=pltpu.CompilerParams(
            dimension_semantics=("parallel",),
            vmem_limit_bytes=32 * 1024 * 1024,
        ),
    )(y_rows, scale_row, shift_row)

    z = z_rows.reshape(N, T_out, V, C_out)                       # free reshape
    # TODO(synk): BatchNorm2d running_mean/running_var momentum updates are training
    # bookkeeping that does not affect the forward output; not reproduced here.
    return jnp.transpose(z, (0, 3, 1, 2))                        # back to NCHW


# --------------------------------------------------------------------------------------
# Pure-JAX reference (matches PyTorch Conv2d + training-mode BatchNorm2d)
# --------------------------------------------------------------------------------------
def _reference_forward(x, w, bias, gamma, beta, *, kernel_size, stride, dilation, eps=1e-5):
    K = kernel_size
    pad = (K + (K - 1) * (dilation - 1) - 1) // 2
    C_out = w.shape[0]
    y = lax.conv_general_dilated(
        x, w, window_strides=(stride, 1),
        padding=((pad, pad), (0, 0)),
        rhs_dilation=(dilation, 1),
        dimension_numbers=("NCHW", "OIHW", "NCHW"),
    ) + bias.reshape(1, C_out, 1, 1)
    mean = jnp.mean(y, axis=(0, 2, 3), keepdims=True)
    var = jnp.mean((y - mean) ** 2, axis=(0, 2, 3), keepdims=True)
    return ((y - mean) / jnp.sqrt(var + eps)) * gamma.reshape(1, C_out, 1, 1) \
        + beta.reshape(1, C_out, 1, 1)


if __name__ == "__main__":
    # Small deterministic shapes: N=2, C_in=4, C_out=8, T=16, V=16, kernel_size=3.
    N, C_in, C_out, T, V = 2, 4, 8, 16, 16
    key = jax.random.PRNGKey(0)
    kx, kw, kb, kg, kbt = jax.random.split(key, 5)
    x = jax.random.normal(kx, (N, C_in, T, V), jnp.float32)

    configs = [
        dict(kernel_size=3, stride=1, dilation=1, t_tile=8),    # tiled T axis (grid 2x2)
        dict(kernel_size=3, stride=1, dilation=2, t_tile=8),    # dilated taps
        dict(kernel_size=3, stride=2, dilation=1, t_tile=None), # stride absorbed in gather
    ]
    for cfg in configs:
        K = cfg["kernel_size"]
        w = jax.random.normal(kw, (C_out, C_in, K, 1), jnp.float32) * 0.1   # PyTorch OIHW
        bias = jax.random.normal(kb, (C_out,), jnp.float32) * 0.1
        gamma = jax.random.uniform(kg, (C_out,), jnp.float32, minval=0.5, maxval=1.5)
        beta = jax.random.normal(kbt, (C_out,), jnp.float32) * 0.1

        fwd = jax.jit(functools.partial(temporal_conv_forward, **cfg))
        out = jax.block_until_ready(fwd(x, w, bias, gamma, beta))

        ref = _reference_forward(x, w, bias, gamma, beta,
                                 kernel_size=K, stride=cfg["stride"], dilation=cfg["dilation"])
        assert out.shape == ref.shape, (cfg, out.shape, ref.shape)
        assert jnp.allclose(out, ref, atol=1e-3, rtol=1e-3), f"mismatch vs reference for {cfg}"

    print("KERNEL_OK")
</pallas_src>

<mosaic_0001>
module attributes {stable_mosaic.version = 11 : i64} {
  func.func @_conv_bn_stats_kernel(%arg0: i32, %arg1: i32, %arg2: memref<1x1x10x16x4xf32, #tpu.memory_space<vmem>>, %arg3: memref<12x8xf32, #tpu.memory_space<vmem>>, %arg4: memref<1x8xf32, #tpu.memory_space<vmem>>, %arg5: memref<1x1x128x8xf32, #tpu.memory_space<vmem>>, %arg6: memref<1x1x1x8xf32, #tpu.memory_space<vmem>>, %arg7: memref<1x1x1x8xf32, #tpu.memory_space<vmem>>) attributes {dimension_semantics = [#tpu.dimension_semantics<parallel>, #tpu.dimension_semantics<parallel>], iteration_bounds = array<i64: 2, 2>, scalar_prefetch = 0 : i64, scratch_operands = 0 : i64, tpu.core_type = #tpu.core_type<tc>, window_params = [{transform_indices = @transform_0, window_bounds = array<i64: 1, 1, 10, 16, 4>}, {pipeline_mode = #tpu.pipeline_mode<synchronous>, transform_indices = @transform_1, window_bounds = array<i64: 12, 8>}, {pipeline_mode = #tpu.pipeline_mode<synchronous>, transform_indices = @transform_2, window_bounds = array<i64: 1, 8>}, {transform_indices = @transform_3, window_bounds = array<i64: 1, 1, 128, 8>}, {transform_indices = @transform_4, window_bounds = array<i64: 1, 1, 1, 8>}, {transform_indices = @transform_5, window_bounds = array<i64: 1, 1, 1, 8>}]} {
    %c0 = arith.constant 0 : index
    %c0_0 = arith.constant 0 : index
    %c0_1 = arith.constant 0 : index
    %c0_2 = arith.constant 0 : index
    %c0_3 = arith.constant 0 : index
    %0 = vector.load %arg2[%c0, %c0_0, %c0_1, %c0_2, %c0_3] : memref<1x1x10x16x4xf32, #tpu.memory_space<vmem>>, vector<1x1x8x16x4xf32>
    %1 = vector.shape_cast %0 : vector<1x1x8x16x4xf32> to vector<8x16x4xf32>
    %2 = vector.shape_cast %1 : vector<8x16x4xf32> to vector<128x4xf32>
    %c0_4 = arith.constant 0 : index
    %c0_5 = arith.constant 0 : index
    %c1 = arith.constant 1 : index
    %c0_6 = arith.constant 0 : index
    %c0_7 = arith.constant 0 : index
    %3 = vector.load %arg2[%c0_4, %c0_5, %c1, %c0_6, %c0_7] : memref<1x1x10x16x4xf32, #tpu.memory_space<vmem>>, vector<1x1x8x16x4xf32>
    %4 = vector.shape_cast %3 : vector<1x1x8x16x4xf32> to vector<8x16x4xf32>
    %5 = vector.shape_cast %4 : vector<8x16x4xf32> to vector<128x4xf32>
    %c0_8 = arith.constant 0 : index
    %c0_9 = arith.constant 0 : index
    %c2 = arith.constant 2 : index
    %c0_10 = arith.constant 0 : index
    %c0_11 = arith.constant 0 : index
    %6 = vector.load %arg2[%c0_8, %c0_9, %c2, %c0_10, %c0_11] : memref<1x1x10x16x4xf32, #tpu.memory_space<vmem>>, vector<1x1x8x16x4xf32>
    %7 = vector.shape_cast %6 : vector<1x1x8x16x4xf32> to vector<8x16x4xf32>
    %8 = vector.shape_cast %7 : vector<8x16x4xf32> to vector<128x4xf32>
    %9 = tpu.concatenate %2, %5, %8 in 1 : vector<128x4xf32>, vector<128x4xf32>, vector<128x4xf32> -> vector<128x12xf32>
    %c0_12 = arith.constant 0 : index
    %c0_13 = arith.constant 0 : index
    %10 = vector.load %arg3[%c0_12, %c0_13] : memref<12x8xf32, #tpu.memory_space<vmem>>, vector<12x8xf32>
    %cst = arith.constant dense<0.000000e+00> : vector<128x8xf32>
    %11 = tpu.matmul %9, %10, %cst {dimension_numbers = #tpu.dot_dimension_numbers<[1], [0], [0], [1], [0, 0, 1, 1], [], []>} : vector<128x12xf32>, vector<12x8xf32>, vector<128x8xf32> -> vector<128x8xf32>
    %c0_14 = arith.constant 0 : index
    %c0_15 = arith.constant 0 : index
    %12 = vector.load %arg4[%c0_14, %c0_15] : memref<1x8xf32, #tpu.memory_space<vmem>>, vector<1x8xf32>
    %13 = vector.broadcast %12 : vector<1x8xf32> to vector<128x8xf32>
    %14 = arith.addf %11, %13 : vector<128x8xf32>
    %cst_16 = arith.constant dense<0.000000e+00> : vector<8xf32>
    %15 = vector.multi_reduction <add>, %14, %cst_16 [0] : vector<128x8xf32> to vector<8xf32>
    %16 = vector.shape_cast %15 : vector<8xf32> to vector<1x8xf32>
    %c0_17 = arith.constant 0 : index
    %c0_18 = arith.constant 0 : index
    %c0_19 = arith.constant 0 : index
    %c0_20 = arith.constant 0 : index
    %17 = vector.load %arg6[%c0_17, %c0_18, %c0_19, %c0_20] : memref<1x1x1x8xf32, #tpu.memory_space<vmem>>, vector<1x1x1x8xf32>
    %18 = vector.shape_cast %17 : vector<1x1x1x8xf32> to vector<1x8xf32>
    %19 = vector.shape_cast %16 : vector<1x8xf32> to vector<1x1x1x8xf32>
    tpu.vector_store %arg6[%c0_17, %c0_18, %c0_19, %c0_20], %19 {strides = array<i32>} : memref<1x1x1x8xf32, #tpu.memory_space<vmem>>, vector<1x1x1x8xf32>,
    %20 = arith.mulf %14, %14 : vector<128x8xf32>
    %cst_21 = arith.constant dense<0.000000e+00> : vector<8xf32>
    %21 = vector.multi_reduction <add>, %20, %cst_21 [0] : vector<128x8xf32> to vector<8xf32>
    %22 = vector.shape_cast %21 : vector<8xf32> to vector<1x8xf32>
    %c0_22 = arith.constant 0 : index
    %c0_23 = arith.constant 0 : index
    %c0_24 = arith.constant 0 : index
    %c0_25 = arith.constant 0 : index
    %23 = vector.load %arg7[%c0_22, %c0_23, %c0_24, %c0_25] : memref<1x1x1x8xf32, #tpu.memory_space<vmem>>, vector<1x1x1x8xf32>
    %24 = vector.shape_cast %23 : vector<1x1x1x8xf32> to vector<1x8xf32>
    %25 = vector.shape_cast %22 : vector<1x8xf32> to vector<1x1x1x8xf32>
    tpu.vector_store %arg7[%c0_22, %c0_23, %c0_24, %c0_25], %25 {strides = array<i32>} : memref<1x1x1x8xf32, #tpu.memory_space<vmem>>, vector<1x1x1x8xf32>,
    %c0_26 = arith.constant 0 : index
    %c0_27 = arith.constant 0 : index
    %c0_28 = arith.constant 0 : index
    %c0_29 = arith.constant 0 : index
    %26 = vector.load %arg5[%c0_26, %c0_27, %c0_28, %c0_29] : memref<1x1x128x8xf32, #tpu.memory_space<vmem>>, vector<1x1x128x8xf32>
    %27 = vector.shape_cast %26 : vector<1x1x128x8xf32> to vector<128x8xf32>
    %28 = vector.shape_cast %14 : vector<128x8xf32> to vector<1x1x128x8xf32>
    tpu.vector_store %arg5[%c0_26, %c0_27, %c0_28, %c0_29], %28 {strides = array<i32>} : memref<1x1x128x8xf32, #tpu.memory_space<vmem>>, vector<1x1x128x8xf32>,
    return
  }
  func.func @transform_0(%arg0: i32, %arg1: i32) -> (i32, i32, i32, i32, i32) {
    %c0_i32 = arith.constant 0 : i32
    %c0_i32_0 = arith.constant 0 : i32
    %c0_i32_1 = arith.constant 0 : i32
    %c0_i32_2 = arith.constant 0 : i32
    return %arg0, %arg1, %c0_i32, %c0_i32_0, %c0_i32_1 : i32, i32, i32, i32, i32
  }
  func.func @transform_1(%arg0: i32, %arg1: i32) -> (i32, i32) {
    %c0_i32 = arith.constant 0 : i32
    %c0_i32_0 = arith.constant 0 : i32
    %c0_i32_1 = arith.constant 0 : i32
    return %c0_i32, %c0_i32_0 : i32, i32
  }
  func.func @transform_2(%arg0: i32, %arg1: i32) -> (i32, i32) {
    %c0_i32 = arith.constant 0 : i32
    %c0_i32_0 = arith.constant 0 : i32
    %c0_i32_1 = arith.constant 0 : i32
    return %c0_i32, %c0_i32_0 : i32, i32
  }
  func.func @transform_3(%arg0: i32, %arg1: i32) -> (i32, i32, i32, i32) {
    %c0_i32 = arith.constant 0 : i32
    %c0_i32_0 = arith.constant 0 : i32
    %c0_i32_1 = arith.constant 0 : i32
    return %arg0, %arg1, %c0_i32, %c0_i32_0 : i32, i32, i32, i32
  }
  func.func @transform_4(%arg0: i32, %arg1: i32) -> (i32, i32, i32, i32) {
    %c0_i32 = arith.constant 0 : i32
    %c0_i32_0 = arith.constant 0 : i32
    %c0_i32_1 = arith.constant 0 : i32
    return %arg0, %arg1, %c0_i32, %c0_i32_0 : i32, i32, i32, i32
  }
  func.func @transform_5(%arg0: i32, %arg1: i32) -> (i32, i32, i32, i32) {
    %c0_i32 = arith.constant 0 : i32
    %c0_i32_0 = arith.constant 0 : i32
    %c0_i32_1 = arith.constant 0 : i32
    return %arg0, %arg1, %c0_i32, %c0_i32_0 : i32, i32, i32, i32
  }
}

module attributes {stable_mosaic.version = 11 : i64} {
  func.func @_bn_apply_kernel(%arg0: i32, %arg1: memref<4x1x1024xf32, #tpu.memory_space<vmem>>, %arg2: memref<1x1x1024xf32, #tpu.memory_space<vmem>>, %arg3: memref<1x1x1024xf32, #tpu.memory_space<vmem>>, %arg4: memref<4x1x1024xf32, #tpu.memory_space<vmem>>) attributes {dimension_semantics = [#tpu.dimension_semantics<parallel>], iteration_bounds = array<i64: 1>, scalar_prefetch = 0 : i64, scratch_operands = 0 : i64, tpu.core_type = #tpu.core_type<tc>, window_params = [{transform_indices = @transform_0, window_bounds = array<i64: 4, 1, 1024>}, {pipeline_mode = #tpu.pipeline_mode<synchronous>, transform_indices = @transform_1, window_bounds = array<i64: 1, 1, 1024>}, {pipeline_mode = #tpu.pipeline_mode<synchronous>, transform_indices = @transform_2, window_bounds = array<i64: 1, 1, 1024>}, {transform_indices = @transform_3, window_bounds = array<i64: 4, 1, 1024>}]} {
    %c0 = arith.constant 0 : index
    %c0_0 = arith.constant 0 : index
    %c0_1 = arith.constant 0 : index
    %0 = vector.load %arg1[%c0, %c0_0, %c0_1] : memref<4x1x1024xf32, #tpu.memory_space<vmem>>, vector<4x1x1024xf32>
    %c0_2 = arith.constant 0 : index
    %c0_3 = arith.constant 0 : index
    %c0_4 = arith.constant 0 : index
    %1 = vector.load %arg2[%c0_2, %c0_3, %c0_4] : memref<1x1x1024xf32, #tpu.memory_space<vmem>>, vector<1x1x1024xf32>
    %2 = vector.broadcast %1 : vector<1x1x1024xf32> to vector<4x1x1024xf32>
    %3 = arith.mulf %0, %2 : vector<4x1x1024xf32>
    %c0_5 = arith.constant 0 : index
    %c0_6 = arith.constant 0 : index
    %c0_7 = arith.constant 0 : index
    %4 = vector.load %arg3[%c0_5, %c0_6, %c0_7] : memref<1x1x1024xf32, #tpu.memory_space<vmem>>, vector<1x1x1024xf32>
    %5 = vector.broadcast %4 : vector<1x1x1024xf32> to vector<4x1x1024xf32>
    %6 = arith.addf %3, %5 : vector<4x1x1024xf32>
    %c0_8 = arith.constant 0 : index
    %c0_9 = arith.constant 0 : index
    %c0_10 = arith.constant 0 : index
    %7 = vector.load %arg4[%c0_8, %c0_9, %c0_10] : memref<4x1x1024xf32, #tpu.memory_space<vmem>>, vector<4x1x1024xf32>
    tpu.vector_store %arg4[%c0_8, %c0_9, %c0_10], %6 {strides = array<i32>} : memref<4x1x1024xf32, #tpu.memory_space<vmem>>, vector<4x1x1024xf32>,
    return
  }
  func.func @transform_0(%arg0: i32) -> (i32, i32, i32) {
    %c0_i32 = arith.constant 0 : i32
    %c0_i32_0 = arith.constant 0 : i32
    %c0_i32_1 = arith.constant 0 : i32
    return %arg0, %c0_i32, %c0_i32_0 : i32, i32, i32
  }
  func.func @transform_1(%arg0: i32) -> (i32, i32, i32) {
    %c0_i32 = arith.constant 0 : i32
    %c0_i32_0 = arith.constant 0 : i32
    %c0_i32_1 = arith.constant 0 : i32
    %c0_i32_2 = arith.constant 0 : i32
    return %c0_i32, %c0_i32_0, %c0_i32_1 : i32, i32, i32
  }
  func.func @transform_2(%arg0: i32) -> (i32, i32, i32) {
    %c0_i32 = arith.constant 0 : i32
    %c0_i32_0 = arith.constant 0 : i32
    %c0_i32_1 = arith.constant 0 : i32
    %c0_i32_2 = arith.constant 0 : i32
    return %c0_i32, %c0_i32_0, %c0_i32_1 : i32, i32, i32
  }
  func.func @transform_3(%arg0: i32) -> (i32, i32, i32) {
    %c0_i32 = arith.constant 0 : i32
    %c0_i32_0 = arith.constant 0 : i32
    %c0_i32_1 = arith.constant 0 : i32
    return %arg0, %c0_i32, %c0_i32_0 : i32, i32, i32
  }
}

</mosaic_0001>

<bundles_post_ra>
// kernel: tile.18
= control target key start
LH: loop header
LB: loop body
LE: loop exit
PB: predicated region body
PF: predicated region fallthrough
CT: control target
= control target key end

     0   :  { %s112_s0 = inlined_call_operand.vmem [shape: f32[8], index: 0, kind: input, shape index: {}]   ;;  %s113_s1 = inlined_call_operand.vmem [shape: f32[128,8], index: 1, kind: output, shape index: {}]  }
   0x1   :  { %v4_v0 = vld [vmem:[%s112_s0] ss:$0 sm:$0xff] }
   0x2   :  { %5 = vst [vmem:[%s113_s1] sm:$0xff] %v4_v0  ;;  %36 = vst [vmem:[%s113_s1 + $0x8] sm:$0xff] %v4_v0 }
   0x3   :  { %37 = vst [vmem:[%s113_s1 + $0x10] sm:$0xff] %v4_v0  ;;  %38 = vst [vmem:[%s113_s1 + $0x18] sm:$0xff] %v4_v0 }
   0x4   :  { %39 = vst [vmem:[%s113_s1 + $0x20] sm:$0xff] %v4_v0  ;;  %40 = vst [vmem:[%s113_s1 + $0x28] sm:$0xff] %v4_v0 }
   0x5   :  { %41 = vst [vmem:[%s113_s1 + $0x30] sm:$0xff] %v4_v0  ;;  %42 = vst [vmem:[%s113_s1 + $0x38] sm:$0xff] %v4_v0 }
   0x6   :  { %43 = vst [vmem:[%s113_s1 + $0x40] sm:$0xff] %v4_v0  ;;  %44 = vst [vmem:[%s113_s1 + $0x48] sm:$0xff] %v4_v0 }
   0x7   :  { %45 = vst [vmem:[%s113_s1 + $0x50] sm:$0xff] %v4_v0  ;;  %46 = vst [vmem:[%s113_s1 + $0x58] sm:$0xff] %v4_v0 }
   0x8   :  { %47 = vst [vmem:[%s113_s1 + $0x60] sm:$0xff] %v4_v0  ;;  %48 = vst [vmem:[%s113_s1 + $0x68] sm:$0xff] %v4_v0 }
   0x9   :  { %49 = vst [vmem:[%s113_s1 + $0x70] sm:$0xff] %v4_v0  ;;  %50 = vst [vmem:[%s113_s1 + $0x78] sm:$0xff] %v4_v0 }

// kernel: tile.19
= control target key start
LH: loop header
LB: loop body
LE: loop exit
PB: predicated region body
PF: predicated region fallthrough
CT: control target
= control target key end

     0   :  { %vm6_vm0 = vcmask 1043458   ;;  %vm10_vm1 = vcmask 1045508   ;;  %vm14_vm2 = vcmask 1047558   ;;  %s20_s6 = smov 3  ;;  %s23_s7 = smov 12  ;;  %vm16_vm3 = vcmask 64512   ;;  %s788_s0 = inlined_call_operand.vmem [shape: f32[128,8], index: 0, kind: input, shape index: {}]   ;;  %s789_s1 = inlined_call_operand.vmem [shape: f32[1,1,1024], index: 1, kind: output, shape index: {}]  }
   0x1   :  { %v417_v0 = vld [vmem:[%s788_s0 + $0xf] ss:$16 sm:%s20_s6]   ;;  %s28_s12 = smov 48  ;;  %s33_s13 = smov 192  ;;  %vm39_vm4 = vcmask 1048512   ;;  %vm62_vm5 = vcmask 982912  }
   0x2   :  { %v418_v1 = vld [vmem:[%s788_s0 + $0xf] ss:$16 sm:%s23_s7]   ;;  %s66_s18 = smov 3  ;;  %s69_s21 = smov 12  ;;  %vm85_vm6 = vcmask 917312   ;;  %vm108_vm7 = vcmask 851712  }
   0x3   :  { %v26_v2 = vsel %vm6_vm0, %v418_v1, %v417_v0  ;;  %v419_v3 = vld [vmem:[%s788_s0 + $0xf] ss:$16 sm:%s28_s12]   ;;  %v425_v6 = vld [vmem:[%s788_s0 + $0xd] ss:$16 sm:%s66_s18]   ;;  %s74_s22 = smov 48  ;;  %s79_s27 = smov 192 }
   0x4   :  { %v420_v4 = vld [vmem:[%s788_s0 + $0xf] ss:$16 sm:%s33_s13]   ;;  %v31_v5 = vsel %vm10_vm1, %v419_v3, %v26_v2  ;;  %v426_v8 = vld [vmem:[%s788_s0 + $0xd] ss:$16 sm:%s69_s21]   ;;  %s499_s28 = smov 120   ;;  %s43_s2 = smov 3 }
   0x5   :  { %v36_v7 = vsel %vm14_vm2, %v420_v4, %v31_v5  ;;  %v427_v9 = vld [vmem:[%s788_s0 + $0xd] ss:$16 sm:%s74_s22]   ;;  %v72_v10 = vsel %vm6_vm0, %v426_v8, %v425_v6  ;;  %s46_s3 = smov 12  ;;  %v421_v13 = vld [vmem:[%s788_s0 + $0xe] ss:$16 sm:%s43_s2]   ;;  %s51_s8 = smov 48 }
   0x6   :  { %37 = vrot.lane.b32.xlu0 %v36_v7, %s499_s28  ;;  %v428_v11 = vld [vmem:[%s788_s0 + $0xd] ss:$16 sm:%s79_s27]   ;;  %v77_v12 = vsel %vm10_vm1, %v427_v9, %v72_v10  ;;  %s56_s9 = smov 192  ;;  %s89_s14 = smov 3  ;;  %vm131_vm8 = vcmask 786112   ;;  %vm154_vm9 = vcmask 720512  }
   0x7   :  { %v422_v14 = vld [vmem:[%s788_s0 + $0xe] ss:$16 sm:%s46_s3]   ;;  %v82_v15 = vsel %vm14_vm2, %v428_v11, %v77_v12  ;;  %s500_s15 = smov 104   ;;  %v429_v20 = vld [vmem:[%s788_s0 + $0xc] ss:$16 sm:%s89_s14]   ;;  %s92_s18 = smov 12 }
   0x8   :  { %v49_v16 = vsel %vm6_vm0, %v422_v14, %v421_v13  ;;  %v423_v17 = vld [vmem:[%s788_s0 + $0xe] ss:$16 sm:%s51_s8]   ;;  %83 = vrot.lane.b32.xlu1 %v82_v15, %s500_s15  ;;  %s97_s19 = smov 48  ;;  %s102_s24 = smov 192  ;;  %vm177_vm10 = vcmask 654912   ;;  %vm200_vm11 = vcmask 589312  }
   0x9   :  { %v424_v18 = vld [vmem:[%s788_s0 + $0xe] ss:$16 sm:%s56_s9]   ;;  %v54_v19 = vsel %vm10_vm1, %v423_v17, %v49_v16  ;;  %v430_v22 = vld [vmem:[%s788_s0 + $0xc] ss:$16 sm:%s92_s18]   ;;  %s501_s25 = smov 112   ;;  %s112_s28 = smov 3 }
   0xa   :  { %v59_v21 = vsel %vm14_vm2, %v424_v18, %v54_v19  ;;  %v431_v23 = vld [vmem:[%s788_s0 + $0xc] ss:$16 sm:%s97_s19]   ;;  %v95_v24 = vsel %vm6_vm0, %v430_v22, %v429_v20  ;;  %s115_s29 = smov 12  ;;  %v433_v27 = vld [vmem:[%s788_s0 + $0xb] ss:$16 sm:%s112_s28]   ;;  %s120_s5 = smov 48 }
   0xb   :  { %60 = vrot.lane.b32.xlu0 %v59_v21, %s501_s25  ;;  %v432_v25 = vld [vmem:[%s788_s0 + $0xc] ss:$16 sm:%s102_s24]   ;;  %v100_v26 = vsel %vm10_vm1, %v431_v23, %v95_v24  ;;  %s125_s6 = smov 192  ;;  %s135_s11 = smov 3  ;;  %vm223_vm12 = vcmask 523712   ;;  %vm246_vm13 = vcmask 458112  }
   0xc   :  { %v434_v28 = vld [vmem:[%s788_s0 + $0xb] ss:$16 sm:%s115_s29]   ;;  %v105_v29 = vsel %vm14_vm2, %v432_v25, %v100_v26  ;;  %s502_s12 = smov 96   ;;  %v437_v34 = vld [vmem:[%s788_s0 + $0xa] ss:$16 sm:%s135_s11]   ;;  %s138_s15 = smov 12 }
   0xd   :  { %v118_v30 = vsel %vm6_vm0, %v434_v28, %v433_v27  ;;  %v435_v31 = vld [vmem:[%s788_s0 + $0xb] ss:$16 sm:%s120_s5]   ;;  %106 = vrot.lane.b32.xlu1 %v105_v29, %s502_s12  ;;  %s143_s16 = smov 48  ;;  %s148_s21 = smov 192  ;;  %vm269_vm14 = vcmask 392512   ;;  %vm292_vm15 = vcmask 326912  }
   0xe   :  { %v436_v32 = vld [vmem:[%s788_s0 + $0xb] ss:$16 sm:%s125_s6]   ;;  %v123_v33 = vsel %vm10_vm1, %v435_v31, %v118_v30  ;;  %v438_v36 = vld [vmem:[%s788_s0 + $0xa] ss:$16 sm:%s138_s15]   ;;  %s503_s22 = smov 88   ;;  %s158_s25 = smov 3 }
   0xf   :  { %v128_v35 = vsel %vm14_vm2, %v436_v32, %v123_v33  ;;  %v439_v37 = vld [vmem:[%s788_s0 + $0xa] ss:$16 sm:%s143_s16]   ;;  %v141_v38 = vsel %vm6_vm0, %v438_v36, %v437_v34  ;;  %s161_s26 = smov 12  ;;  %v441_v41 = vld [vmem:[%s788_s0 + $0x9] ss:$16 sm:%s158_s25]   ;;  %s166_s2 = smov 48 }
  0x10   :  { %129 = vrot.lane.b32.xlu0 %v128_v35, %s503_s22  ;;  %v440_v39 = vld [vmem:[%s788_s0 + $0xa] ss:$16 sm:%s148_s21]   ;;  %v146_v40 = vsel %vm10_vm1, %v439_v37, %v141_v38  ;;  %s171_s3 = smov 192  ;;  %s181_s8 = smov 3 }
  0x11   :  { %v442_v42 = vld [vmem:[%s788_s0 + $0x9] ss:$16 sm:%s161_s26]   ;;  %v151_v43 = vsel %vm14_vm2, %v440_v39, %v146_v40  ;;  %s504_s9 = smov 80   ;;  %v445_v48 = vld [vmem:[%s788_s0 + $0x8] ss:$16 sm:%s181_s8]   ;;  %s184_s12 = smov 12 }
  0x12   :  { %v164_v44 = vsel %vm6_vm0, %v442_v42, %v441_v41  ;;  %v443_v45 = vld [vmem:[%s788_s0 + $0x9] ss:$16 sm:%s166_s2]   ;;  %152 = vrot.lane.b32.xlu1 %v151_v43, %s504_s9  ;;  %s189_s13 = smov 48  ;;  %s194_s18 = smov 192 }
  0x13   :  { %v444_v46 = vld [vmem:[%s788_s0 + $0x9] ss:$16 sm:%s171_s3]   ;;  %v169_v47 = vsel %vm10_vm1, %v443_v45, %v164_v44  ;;  %v446_v50 = vld [vmem:[%s788_s0 + $0x8] ss:$16 sm:%s184_s12]   ;;  %s505_s19 = smov 72   ;;  %s204_s22 = smov 3 }
  0x14   :  { %v174_v49 = vsel %vm14_vm2, %v444_v46, %v169_v47  ;;  %v447_v51 = vld [vmem:[%s788_s0 + $0x8] ss:$16 sm:%s189_s13]   ;;  %v187_v52 = vsel %vm6_vm0, %v446_v50, %v445_v48  ;;  %s207_s23 = smov 12  ;;  %v449_v55 = vld [vmem:[%s788_s0 + $0x7] ss:$16 sm:%s204_s22]   ;;  %s212_s28 = smov 48 }
  0x15   :  { %175 = vrot.lane.b32.xlu0 %v174_v49, %s505_s19  ;;  %v448_v53 = vld [vmem:[%s788_s0 + $0x8] ss:$16 sm:%s194_s18]   ;;  %v192_v54 = vsel %vm10_vm1, %v447_v51, %v187_v52  ;;  %s217_s29 = smov 192  ;;  %s227_s5 = smov 3 }
  0x16   :  { %v450_v56 = vld [vmem:[%s788_s0 + $0x7] ss:$16 sm:%s207_s23]   ;;  %v197_v57 = vsel %vm14_vm2, %v448_v53, %v192_v54  ;;  %s506_s6 = smov 64   ;;  %v453_v62 = vld [vmem:[%s788_s0 + $0x6] ss:$16 sm:%s227_s5]   ;;  %s230_s9 = smov 12 }
  0x17   :  { %v210_v58 = vsel %vm6_vm0, %v450_v56, %v449_v55  ;;  %v451_v59 = vld [vmem:[%s788_s0 + $0x7] ss:$16 sm:%s212_s28]   ;;  %198 = vrot.lane.b32.xlu1 %v197_v57, %s506_s6  ;;  %s235_s10 = smov 48  ;;  %s240_s15 = smov 192 }
  0x18   :  { %v452_v60 = vld [vmem:[%s788_s0 + $0x7] ss:$16 sm:%s217_s29]   ;;  %v215_v61 = vsel %vm10_vm1, %v451_v59, %v210_v58  ;;  %v454_v0 = vld [vmem:[%s788_s0 + $0x6] ss:$16 sm:%s230_s9]   ;;  %s507_s16 = smov 56   ;;  %s250_s19 = smov 3 }
  0x19   :  { %v220_v63 = vsel %vm14_vm2, %v452_v60, %v215_v61  ;;  %v455_v1 = vld [vmem:[%s788_s0 + $0x6] ss:$16 sm:%s235_s10]   ;;  %v233_v2 = vsel %vm6_vm0, %v454_v0, %v453_v62  ;;  %s253_s20 = smov 12  ;;  %v457_v5 = vld [vmem:[%s788_s0 + $0x5] ss:$16 sm:%s250_s19]   ;;  %s258_s25 = smov 48 }
  0x1a   :  { %221 = vrot.lane.b32.xlu0 %v220_v63, %s507_s16  ;;  %v456_v3 = vld [vmem:[%s788_s0 + $0x6] ss:$16 sm:%s240_s15]   ;;  %v238_v4 = vsel %vm10_vm1, %v455_v1, %v233_v2  ;;  %s263_s26 = smov 192  ;;  %s273_s2 = smov 3 }
  0x1b   :  { %v458_v6 = vld [vmem:[%s788_s0 + $0x5] ss:$16 sm:%s253_s20]   ;;  %v243_v7 = vsel %vm14_vm2, %v456_v3, %v238_v4  ;;  %s508_s3 = smov 48   ;;  %v461_v12 = vld [vmem:[%s788_s0 + $0x4] ss:$16 sm:%s273_s2]   ;;  %s276_s6 = smov 12 }
  0x1c   :  { %v256_v8 = vsel %vm6_vm0, %v458_v6, %v457_v5  ;;  %v459_v9 = vld [vmem:[%s788_s0 + $0x5] ss:$16 sm:%s258_s25]   ;;  %244 = vrot.lane.b32.xlu1 %v243_v7, %s508_s3  ;;  %s281_s7 = smov 48  ;;  %s286_s12 = smov 192 }
  0x1d   :  { %v460_v10 = vld [vmem:[%s788_s0 + $0x5] ss:$16 sm:%s263_s26]   ;;  %v261_v11 = vsel %vm10_vm1, %v459_v9, %v256_v8  ;;  %v462_v14 = vld [vmem:[%s788_s0 + $0x4] ss:$16 sm:%s276_s6]   ;;  %s509_s13 = smov 40   ;;  %s296_s16 = smov 3 }
  0x1e   :  { %v266_v13 = vsel %vm14_vm2, %v460_v10, %v261_v11  ;;  %v463_v15 = vld [vmem:[%s788_s0 + $0x4] ss:$16 sm:%s281_s7]   ;;  %v279_v16 = vsel %vm6_vm0, %v462_v14, %v461_v12  ;;  %s299_s17 = smov 12  ;;  %v465_v19 = vld [vmem:[%s788_s0 + $0x3] ss:$16 sm:%s296_s16]   ;;  %s304_s22 = smov 48 }
  0x1f   :  { %267 = vrot.lane.b32.xlu0 %v266_v13, %s509_s13  ;;  %v464_v17 = vld [vmem:[%s788_s0 + $0x4] ss:$16 sm:%s286_s12]   ;;  %v284_v18 = vsel %vm10_vm1, %v463_v15, %v279_v16  ;;  %s309_s23 = smov 192  ;;  %s319_s28 = smov 3 }
  0x20   :  { %v466_v20 = vld [vmem:[%s788_s0 + $0x3] ss:$16 sm:%s299_s17]   ;;  %v289_v21 = vsel %vm14_vm2, %v464_v17, %v284_v18  ;;  %s510_s29 = smov 32   ;;  %v469_v26 = vld [vmem:[%s788_s0 + $0x2] ss:$16 sm:%s319_s28]   ;;  %s322_s3 = smov 12 }
  0x21   :  { %v302_v22 = vsel %vm6_vm0, %v466_v20, %v465_v19  ;;  %v467_v23 = vld [vmem:[%s788_s0 + $0x3] ss:$16 sm:%s304_s22]   ;;  %290 = vrot.lane.b32.xlu1 %v289_v21, %s510_s29  ;;  %s327_s4 = smov 48  ;;  %s332_s9 = smov 192 }
  0x22   :  { %v468_v24 = vld [vmem:[%s788_s0 + $0x3] ss:$16 sm:%s309_s23]   ;;  %v307_v25 = vsel %vm10_vm1, %v467_v23, %v302_v22  ;;  %v470_v28 = vld [vmem:[%s788_s0 + $0x2] ss:$16 sm:%s322_s3]   ;;  %s511_s10 = smov 24   ;;  %s342_s13 = smov 3 }
  0x23   :  { %v312_v27 = vsel %vm14_vm2, %v468_v24, %v307_v25  ;;  %v471_v29 = vld [vmem:[%s788_s0 + $0x2] ss:$16 sm:%s327_s4]   ;;  %v325_v30 = vsel %vm6_vm0, %v470_v28, %v469_v26  ;;  %s345_s14 = smov 12  ;;  %v473_v33 = vld [vmem:[%s788_s0 + $0x1] ss:$16 sm:%s342_s13]   ;;  %s350_s19 = smov 48 }
  0x24   :  { %313 = vrot.lane.b32.xlu0 %v312_v27, %s511_s10  ;;  %v472_v31 = vld [vmem:[%s788_s0 + $0x2] ss:$16 sm:%s332_s9]   ;;  %v330_v32 = vsel %vm10_vm1, %v471_v29, %v325_v30  ;;  %s355_s20 = smov 192  ;;  %s8_s25 = smov 48 }
  0x25   :  { %v474_v34 = vld [vmem:[%s788_s0 + $0x1] ss:$16 sm:%s345_s14]   ;;  %v335_v35 = vsel %vm14_vm2, %v472_v31, %v330_v32  ;;  %s512_s26 = smov 16   ;;  %v9_v40 = vld [vmem:[%s788_s0] ss:$16 sm:%s8_s25]   ;;  %s12_s29 = smov 192 }
  0x26   :  { %v348_v36 = vsel %vm6_vm0, %v474_v34, %v473_v33  ;;  %v475_v37 = vld [vmem:[%s788_s0 + $0x1] ss:$16 sm:%s350_s19]   ;;  %336 = vrot.lane.b32.xlu1 %v335_v35, %s512_s26  ;;  %s2_s30 = smov 3  ;;  %s4_s6 = smov 12 }
  0x27   :  { %v476_v38 = vld [vmem:[%s788_s0 + $0x1] ss:$16 sm:%s355_s20]   ;;  %v353_v39 = vsel %vm10_vm1, %v475_v37, %v348_v36  ;;  %v13_v42 = vld [vmem:[%s788_s0] ss:$16 sm:%s12_s29]   ;;  %s513_s7 = smov 8  }
  0x28   :  { %v358_v41 = vsel %vm14_vm2, %v476_v38, %v353_v39  ;;  %v3_v43 = vld [vmem:[%s788_s0] ss:$16 sm:%s2_s30]  }
  0x29   :  { %359 = vrot.lane.b32.xlu0 %v358_v41, %s513_s7  ;;  %v5_v44 = vld [vmem:[%s788_s0] ss:$16 sm:%s4_s6]  }
  0x2a   :  { %v7_v45 = vsel %vm6_vm0, %v5_v44, %v3_v43  ;;  %vm315_vm0 = vcmask 261312  }
  0x2b   :  { %v11_v46 = vsel %vm10_vm1, %v9_v40, %v7_v45  ;;  %vm338_vm1 = vcmask 195712  }
  0x2c   :  { %v15_v47 = vsel %vm14_vm2, %v13_v42, %v11_v46  ;;  %vm361_vm2 = vcmask 130112  }
  0x2d   :  { %17 = vst.msk [vmem:[#allocation0] ss:$8 sm:$0xf] %vm16_vm3, %v15_v47   ;;  %18 = vst.msk [vmem:[#allocation0] ss:$8 sm:$0xf0] %vm16_vm3, %v15_v47  }
  0x78   :  { %v38_v48 = vpop.permute.xlu0 %37  }
  0x79   :  { %40 = vst.msk [vmem:[#allocation0] ss:$8 sm:$0xf] %vm39_vm4, %v38_v48   ;;  %41 = vst.msk [vmem:[#allocation0] ss:$8 sm:$0xf0] %vm39_vm4, %v38_v48  }
  0x7a   :  { %v84_v49 = vpop.permute.xlu1 %83  }
  0x7d   :  { %v61_v50 = vpop.permute.xlu0 %60  }
  0x7e   :  { %63 = vst.msk [vmem:[#allocation0] ss:$8 sm:$0xf] %vm62_vm5, %v61_v50   ;;  %64 = vst.msk [vmem:[#allocation0] ss:$8 sm:$0xf0] %vm62_vm5, %v61_v50  }
  0x7f   :  { %86 = vst.msk [vmem:[#allocation0] ss:$8 sm:$0xf] %vm85_vm6, %v84_v49   ;;  %87 = vst.msk [vmem:[#allocation0] ss:$8 sm:$0xf0] %vm85_vm6, %v84_v49   ;;  %v107_v51 = vpop.permute.xlu1 %106  }
  0x80   :  { %109 = vst.msk [vmem:[#allocation0] ss:$8 sm:$0xf] %vm108_vm7, %v107_v51   ;;  %110 = vst.msk [vmem:[#allocation0] ss:$8 sm:$0xf0] %vm108_vm7, %v107_v51  }
  0x82   :  { %v130_v52 = vpop.permute.xlu0 %129  }
  0x83   :  { %132 = vst.msk [vmem:[#allocation0] ss:$8 sm:$0xf] %vm131_vm8, %v130_v52   ;;  %133 = vst.msk [vmem:[#allocation0] ss:$8 sm:$0xf0] %vm131_vm8, %v130_v52  }
  0x84   :  { %v153_v53 = vpop.permute.xlu1 %152  }
  0x85   :  { %155 = vst.msk [vmem:[#allocation0] ss:$8 sm:$0xf] %vm154_vm9, %v153_v53   ;;  %156 = vst.msk [vmem:[#allocation0] ss:$8 sm:$0xf0] %vm154_vm9, %v153_v53  }
  0x87   :  { %v176_v54 = vpop.permute.xlu0 %175  }
  0x88   :  { %178 = vst.msk [vmem:[#allocation0] ss:$8 sm:$0xf] %vm177_vm10, %v176_v54   ;;  %179 = vst.msk [vmem:[#allocation0] ss:$8 sm:$0xf0] %vm177_vm10, %v176_v54  }
  0x89   :  { %v199_v55 = vpop.permute.xlu1 %198  }
  0x8a   :  { %201 = vst.msk [vmem:[#allocation0] ss:$8 sm:$0xf] %vm200_vm11, %v199_v55   ;;  %202 = vst.msk [vmem:[#allocation0] ss:$8 sm:$0xf0] %vm200_vm11, %v199_v55  }
  0x8c   :  { %v222_v56 = vpop.permute.xlu0 %221  }
  0x8d   :  { %224 = vst.msk [vmem:[#allocation0] ss:$8 sm:$0xf] %vm223_vm12, %v222_v56   ;;  %225 = vst.msk [vmem:[#allocation0] ss:$8 sm:$0xf0] %vm223_vm12, %v222_v56  }
  0x8e   :  { %v245_v57 = vpop.permute.xlu1 %244  }
  0x8f   :  { %247 = vst.msk [vmem:[#allocation0] ss:$8 sm:$0xf] %vm246_vm13, %v245_v57   ;;  %248 = vst.msk [vmem:[#allocation0] ss:$8 sm:$0xf0] %vm246_vm13, %v245_v57  }
  0x91   :  { %v268_v58 = vpop.permute.xlu0 %267  }
  0x92   :  { %270 = vst.msk [vmem:[#allocation0] ss:$8 sm:$0xf] %vm269_vm14, %v268_v58   ;;  %271 = vst.msk [vmem:[#allocation0] ss:$8 sm:$0xf0] %vm269_vm14, %v268_v58  }
  0x93   :  { %v291_v59 = vpop.permute.xlu1 %290  }
  0x94   :  { %293 = vst.msk [vmem:[#allocation0] ss:$8 sm:$0xf] %vm292_vm15, %v291_v59   ;;  %294 = vst.msk [vmem:[#allocation0] ss:$8 sm:$0xf0] %vm292_vm15, %v291_v59  }
  0x96   :  { %v314_v60 = vpop.permute.xlu0 %313  }
  0x97   :  { %316 = vst.msk [vmem:[#allocation0] ss:$8 sm:$0xf] %vm315_vm0, %v314_v60   ;;  %317 = vst.msk [vmem:[#allocation0] ss:$8 sm:$0xf0] %vm315_vm0, %v314_v60  }
  0x98   :  { %v337_v61 = vpop.permute.xlu1 %336  }
  0x99   :  { %339 = vst.msk [vmem:[#allocation0] ss:$8 sm:$0xf] %vm338_vm1, %v337_v61   ;;  %340 = vst.msk [vmem:[#allocation0] ss:$8 sm:$0xf0] %vm338_vm1, %v337_v61  }
  0x9b   :  { %v360_v62 = vpop.permute.xlu0 %359  }
  0x9c   :  { %362 = vst.msk [vmem:[#allocation0] ss:$8 sm:$0xf] %vm361_vm2, %v360_v62   ;;  %363 = vst.msk [vmem:[#allocation0] ss:$8 sm:$0xf0] %vm361_vm2, %v360_v62  }
  0xa3   :  { %v367_v63 = vld [vmem:[#allocation0] sm:$0x1]  ;;  %v371_v0 = vld [vmem:[#allocation0 + $0x8] sm:$0x1]  ;;  %v376_v1 = vld [vmem:[#allocation0 + $0x10] sm:$0x1] }
  0xa4   :  { %369 = vst [vmem:[%s789_s1] sm:$0x1] %v367_v63  ;;  %477 = vst [vmem:[%s789_s1 + $0x1] sm:$0x1] %v371_v0  ;;  %v382_v2 = vld [vmem:[#allocation0 + $0x18] sm:$0x1] }
  0xa5   :  { %478 = vst [vmem:[%s789_s1 + $0x2] sm:$0x1] %v376_v1  ;;  %v388_v3 = vld [vmem:[#allocation0 + $0x20] sm:$0x1]  ;;  %v394_v4 = vld [vmem:[#allocation0 + $0x28] sm:$0x1] }
  0xa6   :  { %479 = vst [vmem:[%s789_s1 + $0x3] sm:$0x1] %v382_v2  ;;  %480 = vst [vmem:[%s789_s1 + $0x4] sm:$0x1] %v388_v3  ;;  %v400_v5 = vld [vmem:[#allocation0 + $0x30] sm:$0x1] }
  0xa7   :  { %481 = vst [vmem:[%s789_s1 + $0x5] sm:$0x1] %v394_v4  ;;  %v406_v6 = vld [vmem:[#allocation0 + $0x38] sm:$0x1]  ;;  %482 = vst [vmem:[%s789_s1 + $0x6] sm:$0x1] %v400_v5 }
  0xa8   :  { %483 = vst [vmem:[%s789_s1 + $0x7] sm:$0x1] %v406_v6 }

// kernel: temporal_conv_forward.3
= control target key start
LH: loop header
LB: loop body
LE: loop exit
PB: predicated region body
PF: predicated region fallthrough
CT: control target
= control target key end

     0   :  { %s86_s0 = inlined_call_operand.vmem [shape: f32[4,1,1024], index: 0, kind: input, shape index: {}, may-alias: {0,3}]   ;;  %s87_s1 = inlined_call_operand.vmem [shape: f32[1,1,1024], index: 1, kind: input, shape index: {}]   ;;  %s88_s2 = inlined_call_operand.vmem [shape: f32[1,1,1024], index: 2, kind: input, shape index: {}]   ;;  %s89_s3 = inlined_call_operand.vmem [shape: f32[4,1,1024], index: 3, kind: output, shape index: {}, may-alias: {0,3}]  }
   0x1   :  { %v14_v0 = vld [vmem:[%s86_s0] sm:$0xff]  ;;  %v15_v4 = vld [vmem:[%s86_s0 + $0x8] sm:$0xff]  ;;  %v16_v5 = vld [vmem:[%s86_s0 + $0x10] sm:$0xff] }
   0x2   :  { %v18_v1 = vld [vmem:[%s87_s1] sm:$0xff]  ;;  %v17_v6 = vld [vmem:[%s86_s0 + $0x18] sm:$0xff] }
   0x3   :  { %v23_v2 = vld [vmem:[%s88_s2] sm:$0xff]  ;;  %v19_v3 = vmul.f32 %v18_v1, %v14_v0  ;;  %v20_v7 = vmul.f32 %v18_v1, %v15_v4  ;;  %v21_v8 = vmul.f32 %v18_v1, %v16_v5  ;;  %v22_v9 = vmul.f32 %v18_v1, %v17_v6 }
   0x5   :  { %v24_v10 = vadd.f32 %v23_v2, %v19_v3  ;;  %v25_v11 = vadd.f32 %v23_v2, %v20_v7  ;;  %v26_v12 = vadd.f32 %v23_v2, %v21_v8  ;;  %v27_v13 = vadd.f32 %v23_v2, %v22_v9 }
   0x7   :  { %28 = vst [vmem:[%s89_s3] sm:$0xff] %v24_v10  ;;  %29 = vst [vmem:[%s89_s3 + $0x8] sm:$0xff] %v25_v11 }
   0x8   :  { %30 = vst [vmem:[%s89_s3 + $0x10] sm:$0xff] %v26_v12  ;;  %31 = vst [vmem:[%s89_s3 + $0x18] sm:$0xff] %v27_v13 }

// kernel: temporal_conv_forward.2
= control target key start
LH: loop header
LB: loop body
LE: loop exit
PB: predicated region body
PF: predicated region fallthrough
CT: control target
= control target key end

     0   :  { %s1238_s18 = smov 0   ;;  %s1240_s19 = smov 0   ;;  %s1568_s0 = inlined_call_operand.vmem [shape: f32[2,2,10,16,4], index: 0, kind: input, shape index: {}]   ;;  %s1569_s1 = inlined_call_operand.vmem [shape: f32[12,8], index: 1, kind: input, shape index: {}]   ;;  %s1570_s2 = inlined_call_operand.vmem [shape: f32[1,8], index: 2, kind: input, shape index: {}]   ;;  %s1571_s3 = inlined_call_operand.vmem [shape: f32[2,2,128,8], index: 3, kind: output, shape index: {0}]   ;;  %s1572_s4 = inlined_call_operand.vmem [shape: f32[2,2,1,8], index: 4, kind: output, shape index: {1}]   ;;  %s1573_s5 = inlined_call_operand.vmem [shape: f32[2,2,1,8], index: 5, kind: output, shape index: {2}]  }
   0x1   :  { %s1242_s20 = smov 0   ;;  %s1244_s21 = smov 0  }
   0x2   :  { %s1246_s22 = smov 0  }
   0x3 LB: > { %s25_s23 = sadd.s32 1, %s1195_s20  ;;  %s28_s24 = sadd.s32 1, %s1199_s21  ;;  %s1203_s22 = sphi %s1246_s22, %s16_s22   ;;  %s1199_s21 = sphi %s1244_s21, %s1577_s21   ;;  %s1195_s20 = sphi %s1242_s20, %s1576_s20   ;;  %s1191_s19 = sphi %s1240_s19, %s1575_s19   ;;  %s1187_s18 = sphi %s1238_s18, %s1574_s18  }
   0x4   : > { %p26_p0 = scmp.ge.s32.totalorder %s25_s23, 2  ;;  %p1007_p1 = scmp.ge.s32.totalorder %s1203_s22, 1 }
   0x5   : > { %p216_p2 = scmp.lt.s32.totalorder %s1203_s22, 5 }
   0x6   : > { %s1579_s23 = smov (%p26_p0, %s25_s23), 0  ;;  %s1581_s24 = smov (!%p26_p0, %s28_s24), %s1199_s21 }
   0x7   : > { %p217_p3 = pnand %p1007_p1, %p216_p2  ;;  %p30_p4 = scmp.ge.s32.totalorder %s1581_s24, 2 }
   0x8   : > { %p266_p5 = scmp.lt.s32.totalorder (!%p217_p3), %s1191_s19, 1  ;;  %p268_p6 = scmp.lt.s32.totalorder (!%p217_p3), %s1187_s18, 1  ;;  %v510_v0 = vld [vmem:[%s1569_s1] sm:$0xff] (!%p217_p3)  ;;  %v511_v1 = vld [vmem:[%s1569_s1 + $0x8] sm:$0xf] (!%p217_p3)  ;;  %vm568_vm0 = vcmask (!%p217_p3), 1043456  }
   0x9   : > { %s1583_s24 = smov (%p30_p4, %s1581_s24), 0  ;;  %220 = sbr.rel (%p217_p3) target bundleno = 436 (0x1b4), region = 32 }
   0xa   : > { %v1112_v2 = vpack.c.bf16 (!%p217_p3), %v511_v1, %v510_v0  ;;  %vm1205_vm1 = vmmov (!%p217_p3), 1   ;;  %s1206_s11 = smov (!%p217_p3), 8   ;;  %s1207_s12 = smov (!%p217_p3), 4   ;;  %vm476_vm3 = vcmask (!%p217_p3), 31744   ;;  %vm493_vm4 = vcmask (!%p217_p3), 64512  }
   0xb   : > { %vm1113_vm2 = vmpackc.low (!%p217_p3), %vm568_vm0, %vm1205_vm1  ;;  %vm519_vm5 = vcmask (!%p217_p3), 97280   ;;  %vm754_vm6 = vcmask (!%p217_p3), 57344  }
   0xc   : > { %1114 = vmatprep.subr.msk.bf16.mxu0 (!%p217_p3), %vm1113_vm2, %v1112_v2  ;;  %1118 = vmatprep.subr.msk.bf16.mxu1 (!%p217_p3), %vm1113_vm2, %v1112_v2 }
   0xd   : > { %1117 = vmatpush3.bf16.msk.msra.mxu0 (!%p217_p3), %vm1113_vm2, %v1112_v2  ;;  %1119 = vmatpush3.bf16.msk.msra.mxu1 (!%p217_p3), %vm1113_vm2, %v1112_v2 }
  0x10   : > { %s1585_s19 = smov (!%p266_p5, %s1191_s19), 1  ;;  %s1587_s18 = smov (!%p268_p6, %s1187_s18), 1 }
  0x11   : > { %s1121_s29 = smul.u32 40, %s1585_s19  ;;  %s1009_s13 = sshll.u32 %s1587_s18, 4 }
  0x12   : > { %s1120_s30 = smul.u32 20, %s1587_s18  ;;  %s1010_s14 = sshll.u32 %s1585_s19, 5 }
  0x13   : > { %s281_s15 = sadd.s32 %s1010_s14, %s1009_s13 }
  0x14   : > { %s272_s6 = sadd.s32 %s1121_s29, %s1120_s30  ;;  %s1011_s16 = sshll.u32 %s281_s15, 3 }
  0x15   : > { %s1008_s7 = sshll.u32 %s272_s6, 3  ;;  %s1463_s28 = scalar_lea.vmem %s1571_s3, %s1011_s16 }
  0x16   : > { %s1283_s10 = scalar_lea.vmem %s1568_s0, %s1008_s7  ;;  %s1012_s29 = sshll.u32 %s1585_s19, 1 }
  0x17   : > { %v1286_v3 = vld [vmem:[%s1283_s10 + $0x20] sm:$0xff]  ;;  %v1289_v4 = vld [vmem:[%s1283_s10 + $0x10] sm:$0xff]  ;;  %v1296_v5 = vld [vmem:[%s1283_s10 + $0x28] sm:$0xff]  ;;  %s289_s30 = sadd.s32 %s1012_s29, %s1587_s18 }
  0x18   : > { %428 = vrot.lane.b32.xlu1 %v1286_v3, %s1206_s11  ;;  %364 = vrot.lane.b32.xlu0 %v1289_v4, %s1207_s12  ;;  %v1299_v6 = vld [vmem:[%s1283_s10 + $0x18] sm:$0xff]  ;;  %v1313_v8 = vld [vmem:[%s1283_s10 + $0x30] sm:$0xff]  ;;  %s290_s8 = scalar_lea.vmem %s1572_s4, %s289_s30 }
  0x19   : > { %v1310_v7 = vld [vmem:[%s1283_s10 + $0x38] sm:$0xff]  ;;  %v1324_v9 = vld [vmem:[%s1283_s10 + $0x48] sm:$0xff]  ;;  %v1327_v10 = vld [vmem:[%s1283_s10 + $0x40] sm:$0xff] }
  0x1a   : > { %v1338_v11 = vld [vmem:[%s1283_s10 + $0x58] sm:$0xff]  ;;  %v1341_v12 = vld [vmem:[%s1283_s10 + $0x50] sm:$0xff]  ;;  %v1352_v13 = vld [vmem:[%s1283_s10 + $0x68] sm:$0xff] }
  0x1b   : > { %v1355_v14 = vld [vmem:[%s1283_s10 + $0x60] sm:$0xff]  ;;  %v1366_v15 = vld [vmem:[%s1283_s10 + $0x78] sm:$0xff]  ;;  %v1369_v16 = vld [vmem:[%s1283_s10 + $0x70] sm:$0xff] }
  0x1c   : > { %430 = vrot.lane.b32.xlu1 %v1296_v5, %s1206_s11  ;;  %366 = vrot.lane.b32.xlu0 %v1299_v6, %s1207_s12  ;;  %v1043_v17 = vld [vmem:[%s1283_s10 + $0x88] sm:$0xff]  ;;  %v1042_v18 = vld [vmem:[%s1283_s10 + $0x80] sm:$0xff] }
  0x1d   : > { %v1045_v19 = vld [vmem:[%s1283_s10 + $0x98] sm:$0xff]  ;;  %v1044_v20 = vld [vmem:[%s1283_s10 + $0x90] sm:$0xff]  ;;  %v298_v21 = vld [vmem:[%s1283_s10] sm:$0xff] }
  0x1e   : > { %v299_v26 = vld [vmem:[%s1283_s10 + $0x8] sm:$0xff] }
  0x20   : > { %370 = vrot.lane.b32.xlu1 %v1296_v5, %s1207_s12  ;;  %368 = vrot.lane.b32.xlu0 %v1286_v3, %s1207_s12 }
  0x24   : > { %434 = vrot.lane.b32.xlu1 %v1310_v7, %s1206_s11  ;;  %432 = vrot.lane.b32.xlu0 %v1313_v8, %s1206_s11 }
  0x28   : > { %374 = vrot.lane.b32.xlu1 %v1310_v7, %s1207_s12  ;;  %372 = vrot.lane.b32.xlu0 %v1313_v8, %s1207_s12 }
  0x2c   : > { %438 = vrot.lane.b32.xlu1 %v1324_v9, %s1206_s11  ;;  %436 = vrot.lane.b32.xlu0 %v1327_v10, %s1206_s11 }
  0x30   : > { %378 = vrot.lane.b32.xlu1 %v1324_v9, %s1207_s12  ;;  %376 = vrot.lane.b32.xlu0 %v1327_v10, %s1207_s12 }
  0x34   : > { %442 = vrot.lane.b32.xlu1 %v1338_v11, %s1206_s11  ;;  %440 = vrot.lane.b32.xlu0 %v1341_v12, %s1206_s11 }
  0x38   : > { %382 = vrot.lane.b32.xlu1 %v1338_v11, %s1207_s12  ;;  %380 = vrot.lane.b32.xlu0 %v1341_v12, %s1207_s12 }
  0x3c   : > { %446 = vrot.lane.b32.xlu1 %v1352_v13, %s1206_s11  ;;  %444 = vrot.lane.b32.xlu0 %v1355_v14, %s1206_s11 }
  0x40   : > { %386 = vrot.lane.b32.xlu1 %v1352_v13, %s1207_s12  ;;  %384 = vrot.lane.b32.xlu0 %v1355_v14, %s1207_s12 }
  0x44   : > { %450 = vrot.lane.b32.xlu1 %v1366_v15, %s1206_s11  ;;  %448 = vrot.lane.b32.xlu0 %v1369_v16, %s1206_s11 }
  0x48   : > { %390 = vrot.lane.b32.xlu1 %v1366_v15, %s1207_s12  ;;  %388 = vrot.lane.b32.xlu0 %v1369_v16, %s1207_s12 }
  0x4c   : > { %454 = vrot.lane.b32.xlu1 %v1043_v17, %s1206_s11  ;;  %452 = vrot.lane.b32.xlu0 %v1042_v18, %s1206_s11 }
  0x50   : > { %394 = vrot.lane.b32.xlu1 %v1043_v17, %s1207_s12  ;;  %392 = vrot.lane.b32.xlu0 %v1042_v18, %s1207_s12 }
  0x54   : > { %458 = vrot.lane.b32.xlu1 %v1045_v19, %s1206_s11  ;;  %456 = vrot.lane.b32.xlu0 %v1044_v20, %s1206_s11  ;;  %s297_s11 = scalar_lea.vmem %s1573_s5, %s289_s30 }
  0x8a   : > { %v429_v22 = vpop.permute.xlu1 %428  ;;  %v365_v23 = vpop.permute.xlu0 %364 }
  0x8b   : > { %v477_v24 = vsel %vm476_vm3, %v298_v21, %v365_v23 }
  0x8c   : > { %v494_v25 = vsel %vm493_vm4, %v477_v24, %v429_v22 }
  0x8d   : > { %1088 = vmatprep.mubr.msk.f32.mxu0 %vm519_vm5, %v494_v25 }
  0x8e   : > { %v431_v27 = vpop.permute.xlu1 %430  ;;  %v367_v28 = vpop.permute.xlu0 %366 }
  0x8f   : > { %v478_v29 = vsel %vm476_vm3, %v299_v26, %v367_v28 }
  0x90   : > { %v495_v30 = vsel %vm493_vm4, %v478_v29, %v431_v27 }
  0x91   : > { %1089 = vmatmul.mubr.msk.f32.vlgmr.msra.gmra.mrb[0].mxu0 %vm519_vm5, %v495_v30 }
  0x92   : > { %v371_v31 = vpop.permute.xlu1 %370  ;;  %v369_v32 = vpop.permute.xlu0 %368 }
  0x93   : > { %v480_v33 = vsel %vm476_vm3, %v1299_v6, %v371_v31  ;;  %v479_v34 = vsel %vm476_vm3, %v1289_v4, %v369_v32 }
  0x96   : > { %v435_v35 = vpop.permute.xlu1 %434  ;;  %v433_v36 = vpop.permute.xlu0 %432 }
  0x97   : > { %v497_v37 = vsel %vm493_vm4, %v480_v33, %v435_v35  ;;  %v496_v38 = vsel %vm493_vm4, %v479_v34, %v433_v36 }
  0x98   : > { %1091 = vmatprep.mubr.msk.f32.mxu0 %vm519_vm5, %v496_v38 }
  0x99   : > { %1092 = vmatmul.mubr.msk.f32.gmra.mrb[2].mxu0 %vm519_vm5, %v497_v37 }
  0x9a   : > { %v375_v39 = vpop.permute.xlu1 %374  ;;  %v373_v40 = vpop.permute.xlu0 %372 }
  0x9b   : > { %v482_v41 = vsel %vm476_vm3, %v1296_v5, %v375_v39  ;;  %v481_v42 = vsel %vm476_vm3, %v1286_v3, %v373_v40 }
  0x9e   : > { %v439_v43 = vpop.permute.xlu1 %438  ;;  %v437_v44 = vpop.permute.xlu0 %436 }
  0x9f   : > { %v499_v45 = vsel %vm493_vm4, %v482_v41, %v439_v43  ;;  %v498_v46 = vsel %vm493_vm4, %v481_v42, %v437_v44 }
  0xa0   : > { %1094 = vmatprep.mubr.msk.f32.mxu0 %vm519_vm5, %v498_v46 }
  0xa1   : > { %1095 = vmatmul.mubr.msk.f32.gmra.mrb[4].mxu0 %vm519_vm5, %v499_v45 }
  0xa2   : > { %v379_v47 = vpop.permute.xlu1 %378  ;;  %v377_v48 = vpop.permute.xlu0 %376 }
  0xa3   : > { %v484_v49 = vsel %vm476_vm3, %v1310_v7, %v379_v47  ;;  %v483_v50 = vsel %vm476_vm3, %v1313_v8, %v377_v48 }
  0xa6   : > { %v443_v51 = vpop.permute.xlu1 %442  ;;  %v441_v52 = vpop.permute.xlu0 %440 }
  0xa7   : > { %v501_v53 = vsel %vm493_vm4, %v484_v49, %v443_v51  ;;  %v500_v54 = vsel %vm493_vm4, %v483_v50, %v441_v52 }
  0xa8   : > { %1097 = vmatprep.mubr.msk.f32.mxu0 %vm519_vm5, %v500_v54 }
  0xa9   : > { %1098 = vmatmul.mubr.msk.f32.gmra.mrb[6].mxu0 %vm519_vm5, %v501_v53 }
  0xaa   : > { %v383_v55 = vpop.permute.xlu1 %382  ;;  %v381_v56 = vpop.permute.xlu0 %380 }
  0xab   : > { %v486_v57 = vsel %vm476_vm3, %v1324_v9, %v383_v55  ;;  %v485_v58 = vsel %vm476_vm3, %v1327_v10, %v381_v56 }
  0xae   : > { %v447_v59 = vpop.permute.xlu1 %446  ;;  %v445_v60 = vpop.permute.xlu0 %444 }
  0xaf   : > { %v503_v61 = vsel %vm493_vm4, %v486_v57, %v447_v59  ;;  %v502_v62 = vsel %vm493_vm4, %v485_v58, %v445_v60 }
  0xb0   : > { %1100 = vmatprep.mubr.msk.f32.mxu1 %vm519_vm5, %v502_v62 }
  0xb1   : > { %1101 = vmatmul.mubr.msk.f32.vlgmr.msra.gmra.mrb[0].mxu1 %vm519_vm5, %v503_v61 }
  0xb2   : > { %v387_v63 = vpop.permute.xlu1 %386  ;;  %v385_v0 = vpop.permute.xlu0 %384 }
  0xb3   : > { %v488_v1 = vsel %vm476_vm3, %v1338_v11, %v387_v63  ;;  %v487_v2 = vsel %vm476_vm3, %v1341_v12, %v385_v0 }
  0xb6   : > { %v451_v3 = vpop.permute.xlu1 %450  ;;  %v449_v4 = vpop.permute.xlu0 %448 }
  0xb7   : > { %v505_v5 = vsel %vm493_vm4, %v488_v1, %v451_v3  ;;  %v504_v6 = vsel %vm493_vm4, %v487_v2, %v449_v4 }
  0xb8   : > { %1103 = vmatprep.mubr.msk.f32.mxu1 %vm519_vm5, %v504_v6 }
  0xb9   : > { %1104 = vmatmul.mubr.msk.f32.gmra.mrb[2].mxu1 %vm519_vm5, %v505_v5 }
  0xba   : > { %v391_v7 = vpop.permute.xlu1 %390  ;;  %v389_v8 = vpop.permute.xlu0 %388 }
  0xbb   : > { %v490_v9 = vsel %vm476_vm3, %v1352_v13, %v391_v7  ;;  %v489_v10 = vsel %vm476_vm3, %v1355_v14, %v389_v8 }
  0xbe   : > { %v455_v11 = vpop.permute.xlu1 %454  ;;  %v453_v12 = vpop.permute.xlu0 %452 }
  0xbf   : > { %v507_v17 = vsel %vm493_vm4, %v490_v9, %v455_v11  ;;  %v506_v18 = vsel %vm493_vm4, %v489_v10, %v453_v12 }
  0xc0   : > { %1106 = vmatprep.mubr.msk.f32.mxu1 %vm519_vm5, %v506_v18 }
  0xc1   : > { %1107 = vmatmul.mubr.msk.f32.gmra.mrb[4].mxu1 %vm519_vm5, %v507_v17 }
  0xc2   : > { %v395_v19 = vpop.permute.xlu1 %394  ;;  %v393_v20 = vpop.permute.xlu0 %392 }
  0xc3   : > { %v492_v13 = vsel %vm476_vm3, %v1366_v15, %v395_v19  ;;  %v491_v14 = vsel %vm476_vm3, %v1369_v16, %v393_v20  ;;  %v1458_v15 = vld [vmem:[%s1570_s2] ss:$0 sm:$0xff] }
  0xc6   : > { %v459_v21 = vpop.permute.xlu1 %458  ;;  %v457_v22 = vpop.permute.xlu0 %456 }
  0xc7   : > { %v509_v23 = vsel %vm493_vm4, %v492_v13, %v459_v21  ;;  %v508_v24 = vsel %vm493_vm4, %v491_v14, %v457_v22 }
  0xc8   : > { %1109 = vmatprep.mubr.msk.f32.mxu1 %vm519_vm5, %v508_v24 }
  0xc9   : > { %1110 = vmatmul.mubr.msk.f32.gmra.mrb[6].mxu1 %vm519_vm5, %v509_v23 }
 0x164   : > { %v1090_v16 = vpop.f32.mrb[0].mxu0 }
 0x165   : > { %v644_v25 = vadd.f32 %v1090_v16, %v1458_v15  ;;  %v638_v26 = vpop.f32.mrb[1].mxu0 }
 0x166   : > { %v639_v27 = vadd.f32 %v1458_v15, %v638_v26 }
 0x167   : > { %v718_v28 = vsel %vm493_vm4, %v644_v25, 0.0  ;;  %v757_v29 = vmul.f32 %v644_v25, %v644_v25  ;;  %811 = vst.msk [vmem:[%s1463_s28 + $0x8] sm:$0xff] %vm493_vm4, %v644_v25 }
 0x168   : > { %v717_v30 = vsel %vm493_vm4, %v639_v27, 0.0  ;;  %v756_v31 = vmul.f32 %v639_v27, %v639_v27  ;;  %810 = vst.msk [vmem:[%s1463_s28] sm:$0xff] %vm493_vm4, %v639_v27 }
 0x169   : > { %v773_v32 = vsel %vm493_vm4, %v757_v29, 0.0  ;;  %v719_v33 = vadd.f32 %v718_v28, %v717_v30 }
 0x16a   : > { %v772_v34 = vsel %vm493_vm4, %v756_v31, 0.0 }
 0x16b   : > { %v774_v35 = vadd.f32 %v773_v32, %v772_v34 }
 0x16c   : > { %v1093_v36 = vpop.f32.mrb[2].mxu0 }
 0x16d   : > { %v654_v37 = vadd.f32 %v1093_v36, %v1458_v15  ;;  %v648_v38 = vpop.f32.mrb[3].mxu0 }
 0x16e   : > { %v649_v39 = vadd.f32 %v1458_v15, %v648_v38 }
 0x16f   : > { %813 = vst.msk [vmem:[%s1463_s28 + $0x18] sm:$0xff] %vm493_vm4, %v654_v37  ;;  %v759_v40 = vmul.f32 %v654_v37, %v654_v37  ;;  %v722_v44 = vsel %vm493_vm4, %v654_v37, 0.0 }
 0x170   : > { %v720_v41 = vsel %vm493_vm4, %v649_v39, 0.0  ;;  %v758_v42 = vmul.f32 %v649_v39, %v649_v39  ;;  %812 = vst.msk [vmem:[%s1463_s28 + $0x10] sm:$0xff] %vm493_vm4, %v649_v39 }
 0x171   : > { %v721_v43 = vadd.f32 %v720_v41, %v719_v33  ;;  %v777_v48 = vsel %vm493_vm4, %v759_v40, 0.0 }
 0x172   : > { %v775_v45 = vsel %vm493_vm4, %v758_v42, 0.0 }
 0x173   : > { %v776_v46 = vadd.f32 %v775_v45, %v774_v35  ;;  %v723_v47 = vadd.f32 %v722_v44, %v721_v43 }
 0x174   : > { %v1096_v49 = vpop.f32.mrb[4].mxu0 }
 0x175   : > { %v664_v50 = vadd.f32 %v1096_v49, %v1458_v15  ;;  %v658_v51 = vpop.f32.mrb[5].mxu0  ;;  %v778_v52 = vadd.f32 %v777_v48, %v776_v46 }
 0x176   : > { %v659_v53 = vadd.f32 %v1458_v15, %v658_v51 }
 0x177   : > { %815 = vst.msk [vmem:[%s1463_s28 + $0x28] sm:$0xff] %vm493_vm4, %v664_v50  ;;  %v761_v54 = vmul.f32 %v664_v50, %v664_v50  ;;  %v726_v58 = vsel %vm493_vm4, %v664_v50, 0.0 }
 0x178   : > { %v724_v55 = vsel %vm493_vm4, %v659_v53, 0.0  ;;  %v760_v56 = vmul.f32 %v659_v53, %v659_v53  ;;  %814 = vst.msk [vmem:[%s1463_s28 + $0x20] sm:$0xff] %vm493_vm4, %v659_v53 }
 0x179   : > { %v725_v57 = vadd.f32 %v724_v55, %v723_v47  ;;  %v781_v62 = vsel %vm493_vm4, %v761_v54, 0.0 }
 0x17a   : > { %v779_v59 = vsel %vm493_vm4, %v760_v56, 0.0 }
 0x17b   : > { %v780_v60 = vadd.f32 %v779_v59, %v778_v52  ;;  %v727_v61 = vadd.f32 %v726_v58, %v725_v57 }
 0x17c   : > { %v1099_v63 = vpop.f32.mrb[6].mxu0 }
 0x17d   : > { %v674_v0 = vadd.f32 %v1099_v63, %v1458_v15  ;;  %v668_v1 = vpop.f32.mrb[7].mxu0  ;;  %v782_v2 = vadd.f32 %v781_v62, %v780_v60 }
 0x17e   : > { %v669_v3 = vadd.f32 %v1458_v15, %v668_v1 }
 0x17f   : > { %817 = vst.msk [vmem:[%s1463_s28 + $0x38] sm:$0xff] %vm493_vm4, %v674_v0  ;;  %v763_v4 = vmul.f32 %v674_v0, %v674_v0  ;;  %v730_v8 = vsel %vm493_vm4, %v674_v0, 0.0 }
 0x180   : > { %v728_v5 = vsel %vm493_vm4, %v669_v3, 0.0  ;;  %v762_v6 = vmul.f32 %v669_v3, %v669_v3  ;;  %816 = vst.msk [vmem:[%s1463_s28 + $0x30] sm:$0xff] %vm493_vm4, %v669_v3 }
 0x181   : > { %v729_v7 = vadd.f32 %v728_v5, %v727_v61  ;;  %v785_v12 = vsel %vm493_vm4, %v763_v4, 0.0 }
 0x182   : > { %v783_v9 = vsel %vm493_vm4, %v762_v6, 0.0 }
 0x183   : > { %v784_v10 = vadd.f32 %v783_v9, %v782_v2  ;;  %v731_v11 = vadd.f32 %v730_v8, %v729_v7 }
 0x184   : > { %v1102_v17 = vpop.f32.mrb[0].mxu1 }
 0x185   : > { %v684_v18 = vadd.f32 %v1102_v17, %v1458_v15  ;;  %v678_v19 = vpop.f32.mrb[1].mxu1  ;;  %v786_v20 = vadd.f32 %v785_v12, %v784_v10 }
 0x186   : > { %v679_v13 = vadd.f32 %v1458_v15, %v678_v19 }
 0x187   : > { %819 = vst.msk [vmem:[%s1463_s28 + $0x48] sm:$0xff] %vm493_vm4, %v684_v18  ;;  %v765_v14 = vmul.f32 %v684_v18, %v684_v18  ;;  %v734_v24 = vsel %vm493_vm4, %v684_v18, 0.0 }
 0x188   : > { %v732_v21 = vsel %vm493_vm4, %v679_v13, 0.0  ;;  %v764_v22 = vmul.f32 %v679_v13, %v679_v13  ;;  %818 = vst.msk [vmem:[%s1463_s28 + $0x40] sm:$0xff] %vm493_vm4, %v679_v13 }
 0x189   : > { %v733_v23 = vadd.f32 %v732_v21, %v731_v11  ;;  %v789_v27 = vsel %vm493_vm4, %v765_v14, 0.0 }
 0x18a   : > { %v787_v16 = vsel %vm493_vm4, %v764_v22, 0.0 }
 0x18b   : > { %v788_v25 = vadd.f32 %v787_v16, %v786_v20  ;;  %v735_v26 = vadd.f32 %v734_v24, %v733_v23 }
 0x18c   : > { %v1105_v28 = vpop.f32.mrb[2].mxu1 }
 0x18d   : > { %v694_v29 = vadd.f32 %v1105_v28, %v1458_v15  ;;  %v688_v30 = vpop.f32.mrb[3].mxu1  ;;  %v790_v31 = vadd.f32 %v789_v27, %v788_v25 }
 0x18e   : > { %v689_v32 = vadd.f32 %v1458_v15, %v688_v30 }
 0x18f   : > { %821 = vst.msk [vmem:[%s1463_s28 + $0x58] sm:$0xff] %vm493_vm4, %v694_v29  ;;  %v767_v33 = vmul.f32 %v694_v29, %v694_v29  ;;  %v738_v37 = vsel %vm493_vm4, %v694_v29, 0.0 }
 0x190   : > { %v736_v34 = vsel %vm493_vm4, %v689_v32, 0.0  ;;  %v766_v35 = vmul.f32 %v689_v32, %v689_v32  ;;  %820 = vst.msk [vmem:[%s1463_s28 + $0x50] sm:$0xff] %vm493_vm4, %v689_v32 }
 0x191   : > { %v737_v36 = vadd.f32 %v736_v34, %v735_v26  ;;  %v793_v41 = vsel %vm493_vm4, %v767_v33, 0.0 }
 0x192   : > { %v791_v38 = vsel %vm493_vm4, %v766_v35, 0.0 }
 0x193   : > { %v792_v39 = vadd.f32 %v791_v38, %v790_v31  ;;  %v739_v40 = vadd.f32 %v738_v37, %v737_v36 }
 0x194   : > { %v1108_v42 = vpop.f32.mrb[4].mxu1 }
 0x195   : > { %v704_v43 = vadd.f32 %v1108_v42, %v1458_v15  ;;  %v698_v44 = vpop.f32.mrb[5].mxu1  ;;  %v794_v45 = vadd.f32 %v793_v41, %v792_v39 }
 0x196   : > { %v699_v46 = vadd.f32 %v1458_v15, %v698_v44 }
 0x197   : > { %823 = vst.msk [vmem:[%s1463_s28 + $0x68] sm:$0xff] %vm493_vm4, %v704_v43  ;;  %v769_v47 = vmul.f32 %v704_v43, %v704_v43  ;;  %v742_v51 = vsel %vm493_vm4, %v704_v43, 0.0 }
 0x198   : > { %v740_v48 = vsel %vm493_vm4, %v699_v46, 0.0  ;;  %v768_v49 = vmul.f32 %v699_v46, %v699_v46  ;;  %822 = vst.msk [vmem:[%s1463_s28 + $0x60] sm:$0xff] %vm493_vm4, %v699_v46 }
 0x199   : > { %v741_v50 = vadd.f32 %v740_v48, %v739_v40  ;;  %v797_v55 = vsel %vm493_vm4, %v769_v47, 0.0 }
 0x19a   : > { %v795_v52 = vsel %vm493_vm4, %v768_v49, 0.0 }
 0x19b   : > { %v796_v53 = vadd.f32 %v795_v52, %v794_v45  ;;  %v743_v54 = vadd.f32 %v742_v51, %v741_v50 }
 0x19c   : > { %v1111_v56 = vpop.f32.mrb[6].mxu1 }
 0x19d   : > { %v714_v57 = vadd.f32 %v1111_v56, %v1458_v15  ;;  %v708_v58 = vpop.f32.mrb[7].mxu1  ;;  %v798_v59 = vadd.f32 %v797_v55, %v796_v53 }
 0x19e   : > { %v709_v60 = vadd.f32 %v1458_v15, %v708_v58 }
 0x19f   : > { %825 = vst.msk [vmem:[%s1463_s28 + $0x78] sm:$0xff] %vm493_vm4, %v714_v57  ;;  %v771_v61 = vmul.f32 %v714_v57, %v714_v57  ;;  %v746_v1 = vsel %vm493_vm4, %v714_v57, 0.0 }
 0x1a0   : > { %v744_v62 = vsel %vm493_vm4, %v709_v60, 0.0  ;;  %v770_v63 = vmul.f32 %v709_v60, %v709_v60  ;;  %824 = vst.msk [vmem:[%s1463_s28 + $0x70] sm:$0xff] %vm493_vm4, %v709_v60 }
 0x1a1   : > { %v745_v0 = vadd.f32 %v744_v62, %v743_v54  ;;  %v801_v5 = vsel %vm493_vm4, %v771_v61, 0.0 }
 0x1a2   : > { %v799_v2 = vsel %vm493_vm4, %v770_v63, 0.0 }
 0x1a3   : > { %v747_v3 = vadd.f32 %v746_v1, %v745_v0  ;;  %v800_v4 = vadd.f32 %v799_v2, %v798_v59 }
 0x1a5   : > { %v748_v15 = vrot.slane %v747_v3, 4  ;;  %v802_v6 = vadd.f32 %v801_v5, %v800_v4 }
 0x1a7   : > { %v749_v7 = vadd.f32 %v748_v15, %v747_v3  ;;  %v803_v8 = vrot.slane %v802_v6, 4 }
 0x1a9   : > { %v750_v9 = vrot.slane %v749_v7, 2  ;;  %v804_v10 = vadd.f32 %v803_v8, %v802_v6 }
 0x1ab   : > { %v751_v11 = vadd.f32 %v750_v9, %v749_v7  ;;  %v805_v12 = vrot.slane %v804_v10, 2 }
 0x1ad   : > { %v752_v17 = vrot.slane %v751_v11, 1  ;;  %v806_v18 = vadd.f32 %v805_v12, %v804_v10 }
 0x1af   : > { %v753_v19 = vadd.f32 %v752_v17, %v751_v11  ;;  %v807_v20 = vrot.slane %v806_v18, 1 }
 0x1b1   : > { %755 = vst.msk [vmem:[%s290_s8] sm:$0x1] %vm754_vm6, %v753_v19  ;;  %v808_v13 = vadd.f32 %v807_v20, %v806_v18 }
 0x1b3   : > { %809 = vst.msk [vmem:[%s297_s11] sm:$0x1] %vm754_vm6, %v808_v13 }
 0x1b4 PF: > { %s16_s22 = sadd.s32 1, %s1203_s22   ;;  %s1574_s18 = smov %s1195_s20 }
 0x1b5   : > { %p13_p7 = scmp.ge.s32.totalorder %s16_s22, 6   ;;  %s1575_s19 = smov %s1199_s21 }
 0x1b6   : > { %s1576_s20 = smov %s1579_s23  ;;  %s1577_s21 = smov %s1583_s24 }
 0x1b7   :  { %15 = sbr.rel (!%p13_p7) target bundleno = 3 (0x3), region = 88 }

</bundles_post_ra>
